<compile_context>
chip_gen: v5e
topology: v5e:2x2
jax: 0.10.0
libtpu: 0.0.40
codegen_flags: <defaults>
</compile_context>

<pallas_src>
import jax
import jax.numpy as jnp
from jax.experimental import pallas as pl
from jax.experimental.pallas import tpu as pltpu

# ----- model dims (match the PyTorch module) -----
IN_DIM = 26
H1_DIM = 128
H2_DIM = 64
OUT_DIM = 2

# Batch tile cap: multiple of 256 rows (fills the 256-wide MXU) and large enough that
# per-grid-step overhead (~0.35 us) is well amortized.
MAX_TILE_B = 2048


def _mlp_kernel(x_ref, w1_ref, b1_ref, w2_ref, b2_ref, w3_ref, b3_ref, o_ref):
    # fc1 + ReLU  (bf16 MXU matmul, f32 accumulate; bias/ReLU in f32)
    h1 = jnp.dot(x_ref[...], w1_ref[...], preferred_element_type=jnp.float32)
    h1 = jnp.maximum(h1 + b1_ref[...], 0.0)

    # fc2 + ReLU  (bf16 MXU matmul, f32 accumulate)
    h2 = jnp.dot(h1.astype(jnp.bfloat16), w2_ref[...],
                 preferred_element_type=jnp.float32)
    h2 = jnp.maximum(h2 + b2_ref[...], 0.0)

    # fc3 (64 -> 2) off the MXU: two VPU broadcast-multiplies + XLU lane reductions.
    # w3_ref is [2, 64] (PyTorch [out, in]) so each row is already lane-major.
    w3 = w3_ref[...]                                            # [2, 64] f32
    o0 = jnp.sum(h2 * w3[0:1, :], axis=-1, keepdims=True)       # [TB, 1]
    o1 = jnp.sum(h2 * w3[1:2, :], axis=-1, keepdims=True)       # [TB, 1]
    o = jnp.concatenate([o0, o1], axis=-1) + b3_ref[...]        # [TB, 2]
    o_ref[...] = o.astype(o_ref.dtype)


def pack_params(params):
    """One-time repack of PyTorch-convention params into kernel layout.
    fc1/fc2 weights -> [in, out] bf16 (MXU); fc3 weight stays [out, in]=[2,64] f32 (VPU);
    biases -> [1, out] f32. Do this once, reuse per call."""
    return (
        params["w1"].T.astype(jnp.bfloat16),            # [26, 128]
        params["b1"][None, :].astype(jnp.float32),      # [1, 128]
        params["w2"].T.astype(jnp.bfloat16),            # [128, 64]
        params["b2"][None, :].astype(jnp.float32),      # [1, 64]
        params["w3"].astype(jnp.float32),               # [2, 64]  (no transpose)
        params["b3"][None, :].astype(jnp.float32),      # [1, 2]
    )


def _choose_tile(B: int) -> int:
    """Pick the batch tile: single tile for small B; otherwise a multiple of 256 capped
    at MAX_TILE_B, chosen so there are >= 2 grid steps (keeps both v7x cores fed)."""
    if B <= 256:
        return B
    steps = max(2, -(-B // MAX_TILE_B))
    tb = -(-B // steps)
    tb = -(-tb // 256) * 256
    return min(tb, MAX_TILE_B)


def audio_features_net(x, packed):
    """x: [B, 26] float. packed: output of pack_params(). Returns logits [B, 2] f32."""
    B = x.shape[0]
    assert x.shape[1] == IN_DIM
    w1, b1, w2, b2, w3, b3 = packed

    TB = _choose_tile(B)
    G = pl.cdiv(B, TB)

    xb = x.astype(jnp.bfloat16)  # no batch padding: Pallas masks the ragged last block

    const = lambda shape: pl.BlockSpec(shape, lambda i: (0,) * len(shape))

    flops = 2 * B * (IN_DIM * H1_DIM + H1_DIM * H2_DIM + H2_DIM * OUT_DIM)
    bytes_accessed = (
        B * IN_DIM * 2 + B * OUT_DIM * 4
        + (IN_DIM * H1_DIM + H1_DIM * H2_DIM) * 2 + H2_DIM * OUT_DIM * 4
        + (H1_DIM + H2_DIM + OUT_DIM) * 4
    )

    return pl.pallas_call(
        _mlp_kernel,
        out_shape=jax.ShapeDtypeStruct((B, OUT_DIM), jnp.float32),
        grid=(G,),
        in_specs=[
            pl.BlockSpec((TB, IN_DIM), lambda i: (i, 0)),     # x tile
            const((IN_DIM, H1_DIM)), const((1, H1_DIM)),      # fc1 (VMEM-resident)
            const((H1_DIM, H2_DIM)), const((1, H2_DIM)),      # fc2
            const((OUT_DIM, H2_DIM)), const((1, OUT_DIM)),    # fc3 (VPU path)
        ],
        out_specs=pl.BlockSpec((TB, OUT_DIM), lambda i: (i, 0)),
        compiler_params=pltpu.CompilerParams(
            dimension_semantics=("parallel",)),
        cost_estimate=pl.CostEstimate(
            flops=flops, transcendentals=0, bytes_accessed=bytes_accessed),
    )(xb, w1, b1, w2, b2, w3, b3)


def init_params(key):
    """Deterministic synthetic init with PyTorch nn.Linear conventions
    (weight shape [out, in], uniform(-1/sqrt(in), 1/sqrt(in)))."""
    ks = jax.random.split(key, 6)

    def lin(kw, kb, fan_in, fan_out):
        bound = 1.0 / jnp.sqrt(fan_in)
        w = jax.random.uniform(kw, (fan_out, fan_in), jnp.float32, -bound, bound)
        b = jax.random.uniform(kb, (fan_out,), jnp.float32, -bound, bound)
        return w, b

    w1, b1 = lin(ks[0], ks[1], IN_DIM, H1_DIM)
    w2, b2 = lin(ks[2], ks[3], H1_DIM, H2_DIM)
    w3, b3 = lin(ks[4], ks[5], H2_DIM, OUT_DIM)
    return {"w1": w1, "b1": b1, "w2": w2, "b2": b2, "w3": w3, "b3": b3}


def reference_forward(x, p):
    h = jnp.maximum(x @ p["w1"].T + p["b1"], 0.0)
    h = jnp.maximum(h @ p["w2"].T + p["b2"], 0.0)
    return h @ p["w3"].T + p["b3"]


if __name__ == "__main__":
    key = jax.random.PRNGKey(0)
    k_params, k_x = jax.random.split(key)

    params = init_params(k_params)
    packed = pack_params(params)  # one-time repack, reused across forward calls

    # Small demo batch (single tile).
    B = 64
    x = jax.random.normal(k_x, (B, IN_DIM), jnp.float32)
    out = jax.block_until_ready(audio_features_net(x, packed))
    ref = reference_forward(x, params)
    assert out.shape == (B, OUT_DIM)
    # bf16 matmuls with f32 accumulation: loosen tolerance vs the f32 reference.
    assert jnp.allclose(out, ref, atol=2e-2, rtol=2e-2), "mismatch vs reference (B=64)"

    # Ragged-batch check: B=300 -> TB=256, 2 grid steps, second block partially masked.
    B2 = 300
    x2 = jax.random.normal(jax.random.PRNGKey(1), (B2, IN_DIM), jnp.float32)
    out2 = jax.block_until_ready(audio_features_net(x2, packed))
    ref2 = reference_forward(x2, params)
    assert out2.shape == (B2, OUT_DIM)
    assert jnp.allclose(out2, ref2, atol=2e-2, rtol=2e-2), "mismatch vs reference (ragged)"

    print("KERNEL_OK")
</pallas_src>

<mosaic_0001>
module attributes {stable_mosaic.version = 11 : i64} {
  func.func @_mlp_kernel(%arg0: i32, %arg1: memref<64x26xbf16, #tpu.memory_space<vmem>>, %arg2: memref<26x128xbf16, #tpu.memory_space<vmem>>, %arg3: memref<1x128xf32, #tpu.memory_space<vmem>>, %arg4: memref<128x64xbf16, #tpu.memory_space<vmem>>, %arg5: memref<1x64xf32, #tpu.memory_space<vmem>>, %arg6: memref<2x64xf32, #tpu.memory_space<vmem>>, %arg7: memref<1x2xf32, #tpu.memory_space<vmem>>, %arg8: memref<64x2xf32, #tpu.memory_space<vmem>>) attributes {dimension_semantics = [#tpu.dimension_semantics<parallel>], iteration_bounds = array<i64: 1>, scalar_prefetch = 0 : i64, scratch_operands = 0 : i64, tpu.core_type = #tpu.core_type<tc>, window_params = [{transform_indices = @transform_0, window_bounds = array<i64: 64, 26>}, {pipeline_mode = #tpu.pipeline_mode<synchronous>, transform_indices = @transform_1, window_bounds = array<i64: 26, 128>}, {pipeline_mode = #tpu.pipeline_mode<synchronous>, transform_indices = @transform_2, window_bounds = array<i64: 1, 128>}, {pipeline_mode = #tpu.pipeline_mode<synchronous>, transform_indices = @transform_3, window_bounds = array<i64: 128, 64>}, {pipeline_mode = #tpu.pipeline_mode<synchronous>, transform_indices = @transform_4, window_bounds = array<i64: 1, 64>}, {pipeline_mode = #tpu.pipeline_mode<synchronous>, transform_indices = @transform_5, window_bounds = array<i64: 2, 64>}, {pipeline_mode = #tpu.pipeline_mode<synchronous>, transform_indices = @transform_6, window_bounds = array<i64: 1, 2>}, {transform_indices = @transform_7, window_bounds = array<i64: 64, 2>}]} {
    %c0 = arith.constant 0 : index
    %c0_0 = arith.constant 0 : index
    %0 = vector.load %arg1[%c0, %c0_0] : memref<64x26xbf16, #tpu.memory_space<vmem>>, vector<64x26xbf16>
    %c0_1 = arith.constant 0 : index
    %c0_2 = arith.constant 0 : index
    %1 = vector.load %arg2[%c0_1, %c0_2] : memref<26x128xbf16, #tpu.memory_space<vmem>>, vector<26x128xbf16>
    %cst = arith.constant dense<0.000000e+00> : vector<64x128xf32>
    %2 = tpu.matmul %0, %1, %cst {dimension_numbers = #tpu.dot_dimension_numbers<[1], [0], [0], [1], [0, 0, 1, 1], [], []>} : vector<64x26xbf16>, vector<26x128xbf16>, vector<64x128xf32> -> vector<64x128xf32>
    %c0_3 = arith.constant 0 : index
    %c0_4 = arith.constant 0 : index
    %3 = vector.load %arg3[%c0_3, %c0_4] : memref<1x128xf32, #tpu.memory_space<vmem>>, vector<1x128xf32>
    %4 = vector.broadcast %3 : vector<1x128xf32> to vector<64x128xf32>
    %5 = arith.addf %2, %4 : vector<64x128xf32>
    %cst_5 = arith.constant 0.000000e+00 : f32
    %6 = vector.broadcast %cst_5 : f32 to vector<64x128xf32>
    %7 = arith.maximumf %5, %6 : vector<64x128xf32>
    %8 = arith.truncf %7 : vector<64x128xf32> to vector<64x128xbf16>
    %c0_6 = arith.constant 0 : index
    %c0_7 = arith.constant 0 : index
    %9 = vector.load %arg4[%c0_6, %c0_7] : memref<128x64xbf16, #tpu.memory_space<vmem>>, vector<128x64xbf16>
    %cst_8 = arith.constant dense<0.000000e+00> : vector<64x64xf32>
    %10 = tpu.matmul %8, %9, %cst_8 {dimension_numbers = #tpu.dot_dimension_numbers<[1], [0], [0], [1], [0, 0, 1, 1], [], []>} : vector<64x128xbf16>, vector<128x64xbf16>, vector<64x64xf32> -> vector<64x64xf32>
    %c0_9 = arith.constant 0 : index
    %c0_10 = arith.constant 0 : index
    %11 = vector.load %arg5[%c0_9, %c0_10] : memref<1x64xf32, #tpu.memory_space<vmem>>, vector<1x64xf32>
    %12 = vector.broadcast %11 : vector<1x64xf32> to vector<64x64xf32>
    %13 = arith.addf %10, %12 : vector<64x64xf32>
    %cst_11 = arith.constant 0.000000e+00 : f32
    %14 = vector.broadcast %cst_11 : f32 to vector<64x64xf32>
    %15 = arith.maximumf %13, %14 : vector<64x64xf32>
    %c0_12 = arith.constant 0 : index
    %c0_13 = arith.constant 0 : index
    %16 = vector.load %arg6[%c0_12, %c0_13] : memref<2x64xf32, #tpu.memory_space<vmem>>, vector<2x64xf32>
    %17 = vector.extract_strided_slice %16 {offsets = [0, 0], sizes = [1, 64], strides = [1, 1]} : vector<2x64xf32> to vector<1x64xf32>
    %18 = vector.broadcast %17 : vector<1x64xf32> to vector<64x64xf32>
    %19 = arith.mulf %15, %18 : vector<64x64xf32>
    %cst_14 = arith.constant dense<0.000000e+00> : vector<64xf32>
    %20 = vector.multi_reduction <add>, %19, %cst_14 [1] : vector<64x64xf32> to vector<64xf32>
    %21 = vector.shape_cast %20 : vector<64xf32> to vector<64x1xf32>
    %22 = vector.extract_strided_slice %16 {offsets = [1, 0], sizes = [1, 64], strides = [1, 1]} : vector<2x64xf32> to vector<1x64xf32>
    %23 = vector.broadcast %22 : vector<1x64xf32> to vector<64x64xf32>
    %24 = arith.mulf %15, %23 : vector<64x64xf32>
    %cst_15 = arith.constant dense<0.000000e+00> : vector<64xf32>
    %25 = vector.multi_reduction <add>, %24, %cst_15 [1] : vector<64x64xf32> to vector<64xf32>
    %26 = vector.shape_cast %25 : vector<64xf32> to vector<64x1xf32>
    %27 = tpu.concatenate %21, %26 in 1 : vector<64x1xf32>, vector<64x1xf32> -> vector<64x2xf32>
    %c0_16 = arith.constant 0 : index
    %c0_17 = arith.constant 0 : index
    %28 = vector.load %arg7[%c0_16, %c0_17] : memref<1x2xf32, #tpu.memory_space<vmem>>, vector<1x2xf32>
    %29 = vector.broadcast %28 : vector<1x2xf32> to vector<64x2xf32>
    %30 = arith.addf %27, %29 : vector<64x2xf32>
    %c0_18 = arith.constant 0 : index
    %c0_19 = arith.constant 0 : index
    %31 = vector.load %arg8[%c0_18, %c0_19] : memref<64x2xf32, #tpu.memory_space<vmem>>, vector<64x2xf32>
    tpu.vector_store %arg8[%c0_18, %c0_19], %30 {strides = array<i32>} : memref<64x2xf32, #tpu.memory_space<vmem>>, vector<64x2xf32>,
    return
  }
  func.func @transform_0(%arg0: i32) -> (i32, i32) {
    %c0_i32 = arith.constant 0 : i32
    %c0_i32_0 = arith.constant 0 : i32
    return %arg0, %c0_i32 : i32, i32
  }
  func.func @transform_1(%arg0: i32) -> (i32, i32) {
    %c0_i32 = arith.constant 0 : i32
    %c0_i32_0 = arith.constant 0 : i32
    %c0_i32_1 = arith.constant 0 : i32
    return %c0_i32, %c0_i32_0 : i32, i32
  }
  func.func @transform_2(%arg0: i32) -> (i32, i32) {
    %c0_i32 = arith.constant 0 : i32
    %c0_i32_0 = arith.constant 0 : i32
    %c0_i32_1 = arith.constant 0 : i32
    return %c0_i32, %c0_i32_0 : i32, i32
  }
  func.func @transform_3(%arg0: i32) -> (i32, i32) {
    %c0_i32 = arith.constant 0 : i32
    %c0_i32_0 = arith.constant 0 : i32
    %c0_i32_1 = arith.constant 0 : i32
    return %c0_i32, %c0_i32_0 : i32, i32
  }
  func.func @transform_4(%arg0: i32) -> (i32, i32) {
    %c0_i32 = arith.constant 0 : i32
    %c0_i32_0 = arith.constant 0 : i32
    %c0_i32_1 = arith.constant 0 : i32
    return %c0_i32, %c0_i32_0 : i32, i32
  }
  func.func @transform_5(%arg0: i32) -> (i32, i32) {
    %c0_i32 = arith.constant 0 : i32
    %c0_i32_0 = arith.constant 0 : i32
    %c0_i32_1 = arith.constant 0 : i32
    return %c0_i32, %c0_i32_0 : i32, i32
  }
  func.func @transform_6(%arg0: i32) -> (i32, i32) {
    %c0_i32 = arith.constant 0 : i32
    %c0_i32_0 = arith.constant 0 : i32
    %c0_i32_1 = arith.constant 0 : i32
    return %c0_i32, %c0_i32_0 : i32, i32
  }
  func.func @transform_7(%arg0: i32) -> (i32, i32) {
    %c0_i32 = arith.constant 0 : i32
    %c0_i32_0 = arith.constant 0 : i32
    return %arg0, %c0_i32 : i32, i32
  }
}

</mosaic_0001>

<bundles_post_ra>
// kernel: tpu_custom_call.1
= control target key start
LH: loop header
LB: loop body
LE: loop exit
PB: predicated region body
PF: predicated region fallthrough
CT: control target
= control target key end

     0   :  { %vm87_vm0 = vcmask 1044480   ;;  %vm74_vm1 = vcmask 211968   ;;  %vm247_vm2 = vcmask 523264   ;;  %vm305_vm3 = vcmask 7168   ;;  %s621_s1 = inlined_call_operand.vmem [shape: bf16[26,128], index: 1, kind: input, shape index: {}]   ;;  %s622_s2 = inlined_call_operand.vmem [shape: f32[1,128], index: 2, kind: input, shape index: {}]   ;;  %s623_s0 = inlined_call_operand.vmem [shape: bf16[64,26], index: 0, kind: input, shape index: {}]   ;;  %s624_s3 = inlined_call_operand.vmem [shape: bf16[128,64], index: 3, kind: input, shape index: {}]   ;;  %s625_s4 = inlined_call_operand.vmem [shape: f32[1,64], index: 4, kind: input, shape index: {}]   ;;  %s626_s5 = inlined_call_operand.vmem [shape: f32[2,64], index: 5, kind: input, shape index: {}]   ;;  %s627_s6 = inlined_call_operand.vmem [shape: f32[1,2], index: 6, kind: input, shape index: {}]   ;;  %s628_s7 = inlined_call_operand.vmem [shape: f32[64,2], index: 7, kind: output, shape index: {}]  }
   0x1   :  { %v361_v0 = vld [vmem:[%s621_s1 + $0x8] sm:$0xf]  ;;  %v404_v1 = vld [vmem:[%s621_s1 + $0x8] sm:$0x10]  ;;  %v403_v4 = vld [vmem:[%s621_s1] sm:$0xff]  ;;  %vm326_vm4 = vcmask 15360  }
   0x2   :  { %v362_v2 = vor.u32 %v404_v1, %v361_v0  ;;  %v399_v5 = vld [vmem:[%s623_s0] sm:$0xff]  ;;  %v400_v6 = vld [vmem:[%s623_s0 + $0x8] sm:$0xff]  ;;  %v412_v7 = vld [vmem:[%s624_s3 + $0x38] sm:$0xff] }
   0x3   :  { %v411_v8 = vld [vmem:[%s624_s3 + $0x30] sm:$0xff]  ;;  %415 = vmatpush.bf16.msra.mxu1 %v412_v7  ;;  %416 = vmatpush.bf16.msra.mxu2 %v412_v7  ;;  %v410_v9 = vld [vmem:[%s624_s3 + $0x28] sm:$0xff]  ;;  %v409_v10 = vld [vmem:[%s624_s3 + $0x20] sm:$0xff] }
   0x4   :  { %v89_v3 = vsel %vm87_vm0, %v362_v2, 0  ;;  %v401_v11 = vld [vmem:[%s623_s0 + $0x10] sm:$0xff]  ;;  %v402_v12 = vld [vmem:[%s623_s0 + $0x18] sm:$0xff]  ;;  %v406_v15 = vld [vmem:[%s624_s3 + $0x8] sm:$0xff] }
   0x5   :  { %97 = vmatpush.bf16.msra.mxu0 %v89_v3  ;;  %413 = vmatpush.bf16.msra.mxu3 %v89_v3  ;;  %v408_v13 = vld [vmem:[%s624_s3 + $0x18] sm:$0xff]  ;;  %v407_v14 = vld [vmem:[%s624_s3 + $0x10] sm:$0xff]  ;;  %v405_v16 = vld [vmem:[%s624_s3] sm:$0xff] }
   0x6   :  { %v431_v18 = vld [vmem:[%s622_s2] ss:$0 sm:$0xff] }
   0x7   :  { %417 = vmatpush.bf16.msra.mxu1 %v411_v8  ;;  %418 = vmatpush.bf16.msra.mxu2 %v411_v8  ;;  %v529_v46 = vld [vmem:[%s625_s4] ss:$0 sm:$0xff] }
   0x8   :  { %v237_v47 = vld [vmem:[%s626_s5] sm:$0x3] }
   0x9   :  { %98 = vmatpush.bf16.msra.mxu0 %v403_v4  ;;  %414 = vmatpush.bf16.msra.mxu3 %v403_v4  ;;  %v535_v50 = vperm.slane %v237_v47, 0  ;;  %v537_v51 = vperm.slane %v237_v47, 1 }
   0xb   :  { %419 = vmatpush.bf16.msra.mxu1 %v410_v9  ;;  %420 = vmatpush.bf16.msra.mxu2 %v410_v9 }
   0xc   :  { %363 = vmatmul.msk.bf16.vlgmr.msra.gmra.mxu0 %vm74_vm1, %v399_v5  ;;  %364 = vmatmul.msk.bf16.vlgmr.msra.gmra.mxu3 %vm74_vm1, %v400_v6 }
   0xd   :  { %200 = vmatpush.bf16.msrb.mxu0 %v412_v7 }
   0xf   :  { %421 = vmatpush.bf16.msra.mxu1 %v409_v10  ;;  %422 = vmatpush.bf16.msra.mxu2 %v409_v10 }
  0x11   :  { %201 = vmatpush.bf16.msrb.mxu0 %v411_v8 }
  0x13   :  { %423 = vmatpush.bf16.msra.mxu1 %v408_v13  ;;  %424 = vmatpush.bf16.msra.mxu2 %v408_v13 }
  0x15   :  { %202 = vmatpush.bf16.msrb.mxu0 %v410_v9 }
  0x17   :  { %425 = vmatpush.bf16.msra.mxu1 %v407_v14  ;;  %426 = vmatpush.bf16.msra.mxu2 %v407_v14 }
  0x19   :  { %203 = vmatpush.bf16.msrb.mxu0 %v409_v10 }
  0x1b   :  { %427 = vmatpush.bf16.msra.mxu1 %v406_v15  ;;  %428 = vmatpush.bf16.msra.mxu2 %v406_v15 }
  0x1c   :  { %365 = vmatmul.msk.bf16.gmra.mxu3 %vm74_vm1, %v401_v11 }
  0x1d   :  { %204 = vmatpush.bf16.msrb.mxu0 %v408_v13 }
  0x1f   :  { %429 = vmatpush.bf16.msra.mxu1 %v405_v16  ;;  %430 = vmatpush.bf16.msra.mxu2 %v405_v16 }
  0x21   :  { %205 = vmatpush.bf16.msrb.mxu0 %v407_v14 }
  0x25   :  { %206 = vmatpush.bf16.msrb.mxu0 %v406_v15 }
  0x29   :  { %207 = vmatpush.bf16.msrb.mxu0 %v405_v16 }
  0x2c   :  { %366 = vmatmul.msk.bf16.gmra.mxu3 %vm74_vm1, %v402_v12 }
  0x89   :  { %v100_v17 = vpop.f32.mrf.mxu0 }
  0x8a   :  { %v101_v19 = vadd.f32 %v431_v18, %v100_v17 }
  0x8c   :  { %v120_v22 = vmax.f32 %v101_v19, 0.0 }
  0x8f   :  { %v105_v20 = vpop.f32.mrf.mxu3 }
  0x90   :  { %v106_v25 = vadd.f32 %v431_v18, %v105_v20 }
  0x91   :  { %v102_v21 = vpop.f32.mrf.mxu0 }
  0x92   :  { %v103_v23 = vadd.f32 %v431_v18, %v102_v21  ;;  %v122_v29 = vmax.f32 %v106_v25, 0.0 }
  0x94   :  { %v121_v24 = vmax.f32 %v103_v23, 0.0 }
  0x96   :  { %v128_v26 = vpack.c.bf16 %v121_v24, %v120_v22 }
  0x97   :  { %v107_v27 = vpop.f32.mrf.mxu3 }
  0x98   :  { %v108_v28 = vadd.f32 %v431_v18, %v107_v27  ;;  %208 = vmatmul.bf16.vlgmr.msrb.gmra.mxu0 %v128_v26 }
  0x9a   :  { %v123_v30 = vmax.f32 %v108_v28, 0.0 }
  0x9c   :  { %v129_v31 = vpack.c.bf16 %v123_v30, %v122_v29 }
  0x9e   :  { %213 = vmatmul.bf16.vlgmr.msra.gmra.mxu1 %v129_v31 }
  0x9f   :  { %v110_v32 = vpop.f32.mrf.mxu3 }
  0xa0   :  { %v111_v33 = vadd.f32 %v431_v18, %v110_v32 }
  0xa2   :  { %v124_v36 = vmax.f32 %v111_v33, 0.0 }
  0xa7   :  { %v112_v34 = vpop.f32.mrf.mxu3 }
  0xa8   :  { %v113_v35 = vadd.f32 %v431_v18, %v112_v34 }
  0xaa   :  { %v125_v37 = vmax.f32 %v113_v35, 0.0 }
  0xac   :  { %v130_v38 = vpack.c.bf16 %v125_v37, %v124_v36 }
  0xae   :  { %218 = vmatmul.bf16.vlgmr.msra.gmra.mxu2 %v130_v38 }
  0xaf   :  { %v115_v39 = vpop.f32.mrf.mxu3 }
  0xb0   :  { %v116_v40 = vadd.f32 %v431_v18, %v115_v39 }
  0xb2   :  { %v126_v43 = vmax.f32 %v116_v40, 0.0 }
  0xb7   :  { %v117_v41 = vpop.f32.mrf.mxu3 }
  0xb8   :  { %v118_v42 = vadd.f32 %v431_v18, %v117_v41 }
  0xba   :  { %v127_v44 = vmax.f32 %v118_v42, 0.0  ;;  %v433_v42 = vld [vmem:[%s627_s6] ss:$0 sm:$0xff] }
  0xbc   :  { %v131_v45 = vpack.c.bf16 %v127_v44, %v126_v43 }
  0xbe   :  { %223 = vmatmul.bf16.gmra.mxu2 %v131_v45 }
 0x115   :  { %v209_v48 = vpop.f32.mrf.mxu0 }
 0x116   :  { %v210_v49 = vadd.f32 %v529_v46, %v209_v48 }
 0x118   :  { %v229_v52 = vmax.f32 %v210_v49, 0.0 }
 0x11a   :  { %v239_v53 = vmul.f32 %v535_v50, %v229_v52  ;;  %v273_v54 = vmul.f32 %v537_v51, %v229_v52 }
 0x11b   :  { %v214_v55 = vpop.f32.mrf.mxu1 }
 0x11c   :  { %v215_v56 = vadd.f32 %v529_v46, %v214_v55  ;;  %v248_v57 = vsel %vm247_vm2, %v239_v53, 0.0  ;;  %v281_v58 = vsel %vm247_vm2, %v273_v54, 0.0 }
 0x11d   :  { %v211_v59 = vpop.f32.mrf.mxu0  ;;  %249 = vadd.xlane.f32.xlu0 %v248_v57  ;;  %282 = vadd.xlane.f32.xlu2 %v281_v58 }
 0x11e   :  { %v231_v60 = vmax.f32 %v215_v56, 0.0  ;;  %v212_v61 = vadd.f32 %v529_v46, %v211_v59 }
 0x120   :  { %v230_v62 = vmax.f32 %v212_v61, 0.0  ;;  %v241_v63 = vmul.f32 %v535_v50, %v231_v60  ;;  %v275_v6 = vmul.f32 %v537_v51, %v231_v60 }
 0x122   :  { %v254_v0 = vsel %vm247_vm2, %v241_v63, 0.0  ;;  %v240_v1 = vmul.f32 %v535_v50, %v230_v62  ;;  %v274_v8 = vmul.f32 %v537_v51, %v230_v62  ;;  %v287_v9 = vsel %vm247_vm2, %v275_v6, 0.0 }
 0x123   :  { %v216_v2 = vpop.f32.mrf.mxu1  ;;  %255 = vadd.xlane.f32.xlu1 %v254_v0 }
 0x124   :  { %v217_v3 = vadd.f32 %v529_v46, %v216_v2  ;;  %v251_v4 = vsel %vm247_vm2, %v240_v1, 0.0  ;;  %v284_v11 = vsel %vm247_vm2, %v274_v8, 0.0 }
 0x125   :  { %252 = vadd.xlane.f32.xlu0 %v251_v4 }
 0x126   :  { %v232_v5 = vmax.f32 %v217_v3, 0.0 }
 0x128   :  { %v276_v7 = vmul.f32 %v537_v51, %v232_v5  ;;  %v242_v12 = vmul.f32 %v535_v50, %v232_v5 }
 0x12a   :  { %v290_v10 = vsel %vm247_vm2, %v276_v7, 0.0  ;;  %v257_v15 = vsel %vm247_vm2, %v242_v12, 0.0 }
 0x12b   :  { %288 = vadd.xlane.f32.xlu1 %v287_v9  ;;  %291 = vadd.xlane.f32.xlu2 %v290_v10 }
 0x12d   :  { %285 = vadd.xlane.f32.xlu0 %v284_v11 }
 0x131   :  { %v219_v13 = vpop.f32.mrf.mxu2 }
 0x132   :  { %v220_v14 = vadd.f32 %v529_v46, %v219_v13 }
 0x133   :  { %258 = vadd.xlane.f32.xlu1 %v257_v15 }
 0x134   :  { %v233_v16 = vmax.f32 %v220_v14, 0.0 }
 0x136   :  { %v243_v17 = vmul.f32 %v535_v50, %v233_v16  ;;  %v277_v18 = vmul.f32 %v537_v51, %v233_v16 }
 0x138   :  { %v260_v19 = vsel %vm247_vm2, %v243_v17, 0.0  ;;  %v293_v20 = vsel %vm247_vm2, %v277_v18, 0.0 }
 0x139   :  { %v221_v21 = vpop.f32.mrf.mxu2  ;;  %261 = vadd.xlane.f32.xlu2 %v260_v19  ;;  %294 = vadd.xlane.f32.xlu0 %v293_v20 }
 0x13a   :  { %v222_v22 = vadd.f32 %v529_v46, %v221_v21 }
 0x13c   :  { %v234_v23 = vmax.f32 %v222_v22, 0.0 }
 0x13e   :  { %v244_v24 = vmul.f32 %v535_v50, %v234_v23  ;;  %v278_v40 = vmul.f32 %v537_v51, %v234_v23 }
 0x140   :  { %v263_v25 = vsel %vm247_vm2, %v244_v24, 0.0  ;;  %v296_v41 = vsel %vm247_vm2, %v278_v40, 0.0 }
 0x141   :  { %v224_v26 = vpop.f32.mrf.mxu2  ;;  %264 = vadd.xlane.f32.xlu2 %v263_v25 }
 0x142   :  { %v225_v27 = vadd.f32 %v529_v46, %v224_v26 }
 0x144   :  { %v235_v28 = vmax.f32 %v225_v27, 0.0 }
 0x146   :  { %v279_v29 = vmul.f32 %v537_v51, %v235_v28  ;;  %v245_v30 = vmul.f32 %v535_v50, %v235_v28 }
 0x148   :  { %v299_v31 = vsel %vm247_vm2, %v279_v29, 0.0  ;;  %v266_v32 = vsel %vm247_vm2, %v245_v30, 0.0 }
 0x149   :  { %v226_v33 = vpop.f32.mrf.mxu2  ;;  %300 = vadd.xlane.f32.xlu2 %v299_v31  ;;  %267 = vadd.xlane.f32.xlu0 %v266_v32 }
 0x14a   :  { %v227_v34 = vadd.f32 %v529_v46, %v226_v33 }
 0x14c   :  { %v236_v35 = vmax.f32 %v227_v34, 0.0 }
 0x14e   :  { %v246_v36 = vmul.f32 %v535_v50, %v236_v35  ;;  %v280_v37 = vmul.f32 %v537_v51, %v236_v35 }
 0x150   :  { %v269_v38 = vsel %vm247_vm2, %v246_v36, 0.0  ;;  %v302_v39 = vsel %vm247_vm2, %v280_v37, 0.0 }
 0x151   :  { %270 = vadd.xlane.f32.xlu1 %v269_v38  ;;  %303 = vadd.xlane.f32.xlu0 %v302_v39 }
 0x159   :  { %297 = vadd.xlane.f32.xlu1 %v296_v41 }
 0x190   :  { %v250_v43 = vpop.xlane.xlu0 %249  ;;  %v283_v44 = vpop.xlane.xlu2 %282 }
 0x191   :  { %v306_v45 = vsel %vm305_vm3, %v250_v43, %v283_v44 }
 0x192   :  { %v318_v46 = vadd.f32 %v433_v42, %v306_v45 }
 0x194   :  { %327 = vst.msk [vmem:[%s628_s7] sm:$0xff] %vm326_vm4, %v318_v46 }
 0x196   :  { %v256_v47 = vpop.xlane.xlu1 %255 }
 0x198   :  { %v253_v48 = vpop.xlane.xlu0 %252 }
 0x19e   :  { %v289_v49 = vpop.xlane.xlu1 %288  ;;  %v292_v55 = vpop.xlane.xlu2 %291 }
 0x19f   :  { %v308_v50 = vsel %vm305_vm3, %v256_v47, %v289_v49 }
 0x1a0   :  { %v320_v51 = vadd.f32 %v433_v42, %v308_v50  ;;  %v286_v52 = vpop.xlane.xlu0 %285 }
 0x1a1   :  { %v307_v53 = vsel %vm305_vm3, %v253_v48, %v286_v52 }
 0x1a2   :  { %329 = vst.msk [vmem:[%s628_s7 + $0x10] sm:$0xff] %vm326_vm4, %v320_v51  ;;  %v319_v54 = vadd.f32 %v433_v42, %v307_v53 }
 0x1a4   :  { %328 = vst.msk [vmem:[%s628_s7 + $0x8] sm:$0xff] %vm326_vm4, %v319_v54 }
 0x1a6   :  { %v259_v56 = vpop.xlane.xlu1 %258 }
 0x1a7   :  { %v309_v57 = vsel %vm305_vm3, %v259_v56, %v292_v55 }
 0x1a8   :  { %v321_v58 = vadd.f32 %v433_v42, %v309_v57 }
 0x1aa   :  { %330 = vst.msk [vmem:[%s628_s7 + $0x18] sm:$0xff] %vm326_vm4, %v321_v58 }
 0x1ac   :  { %v262_v59 = vpop.xlane.xlu2 %261  ;;  %v295_v60 = vpop.xlane.xlu0 %294 }
 0x1ad   :  { %v310_v61 = vsel %vm305_vm3, %v262_v59, %v295_v60 }
 0x1ae   :  { %v322_v62 = vadd.f32 %v433_v42, %v310_v61 }
 0x1b0   :  { %331 = vst.msk [vmem:[%s628_s7 + $0x20] sm:$0xff] %vm326_vm4, %v322_v62 }
 0x1b4   :  { %v265_v63 = vpop.xlane.xlu2 %264 }
 0x1bc   :  { %v301_v0 = vpop.xlane.xlu2 %300  ;;  %v268_v1 = vpop.xlane.xlu0 %267 }
 0x1bd   :  { %v312_v2 = vsel %vm305_vm3, %v268_v1, %v301_v0 }
 0x1be   :  { %v324_v3 = vadd.f32 %v433_v42, %v312_v2 }
 0x1c0   :  { %333 = vst.msk [vmem:[%s628_s7 + $0x30] sm:$0xff] %vm326_vm4, %v324_v3 }
 0x1c4   :  { %v271_v4 = vpop.xlane.xlu1 %270  ;;  %v304_v5 = vpop.xlane.xlu0 %303 }
 0x1c5   :  { %v313_v6 = vsel %vm305_vm3, %v271_v4, %v304_v5 }
 0x1c6   :  { %v325_v7 = vadd.f32 %v433_v42, %v313_v6 }
 0x1c8   :  { %334 = vst.msk [vmem:[%s628_s7 + $0x38] sm:$0xff] %vm326_vm4, %v325_v7 }
 0x1cc   :  { %v298_v8 = vpop.xlane.xlu1 %297 }
 0x1cd   :  { %v311_v9 = vsel %vm305_vm3, %v265_v63, %v298_v8 }
 0x1ce   :  { %v323_v10 = vadd.f32 %v433_v42, %v311_v9 }
 0x1d0   :  { %332 = vst.msk [vmem:[%s628_s7 + $0x28] sm:$0xff] %vm326_vm4, %v323_v10 }

</bundles_post_ra>
